<compile_context>
chip_gen: v6e
topology: v6e:2x2x1
jax: 0.10.0
libtpu: 0.0.40
codegen_flags: <defaults>
</compile_context>

<pallas_src>
import jax
import jax.numpy as jnp
from jax.experimental import pallas as pl
from jax.experimental.pallas import tpu as pltpu


_REEIG_EPS = 1e-4  # torchspdnet ReEig eigenvalue clamp threshold


# ---------------------------------------------------------------------------
# Kernel 1: ReEig reconstruction  R = U diag(max(l, eps)) U^T  (BB matrices / step)
# ---------------------------------------------------------------------------
def _reeig_recon_kernel(u_ref, s_ref, out_ref):
    # u_ref:   (BB, n, n)  eigenvectors (columns)
    # s_ref:   (BB, 1, n)  eigenvalues
    # out_ref: (BB, n, n)
    u = u_ref[...].astype(jnp.float32)
    s = jnp.maximum(s_ref[...].astype(jnp.float32), _REEIG_EPS)      # (BB, 1, n)
    us = u * s                                                        # scale columns by clamped eigenvalues
    out_ref[...] = jnp.einsum(
        "bij,bkj->bik", us, u, preferred_element_type=jnp.float32
    ).astype(out_ref.dtype)


# ---------------------------------------------------------------------------
# Kernel 2: diagonal embedding  out[k, i, j] = v[k, i] if i == j else 0
# ---------------------------------------------------------------------------
def _diag_kernel(v_ref, out_ref):
    # v_ref:   (1, 1, M)   full value row for head k
    # out_ref: (1, TM, M)  rows [i*TM, (i+1)*TM) of the (M, M) diagonal matrix
    i = pl.program_id(1)
    tm, m = out_ref.shape[1], out_ref.shape[2]
    row = jax.lax.broadcasted_iota(jnp.int32, (tm, m), 0) + i * tm    # global row index
    col = jax.lax.broadcasted_iota(jnp.int32, (tm, m), 1)
    vals = v_ref[0].astype(jnp.float32)                               # (1, M), lane-aligned broadcast
    out_ref[0] = jnp.where(row == col, vals, 0.0).astype(out_ref.dtype)


# ---------------------------------------------------------------------------
# Block-size helpers
# ---------------------------------------------------------------------------
def _pick_batch_block(bh, n, max_block_bytes=2 << 20):
    """Largest divisor of bh whose (bb, n, n) fp32 block stays under max_block_bytes."""
    cap = max(1, max_block_bytes // (n * n * 4))
    bb = min(bh, cap)
    while bb > 1 and bh % bb != 0:
        bb -= 1
    return bb


def _pick_row_block(m, max_block_bytes=4 << 20):
    """Row-tile TM for the (h, M, M) diagonal output; keeps (TM, M) fp32 under cap."""
    if m * m * 4 <= max_block_bytes:
        return m                      # full-dim block (exempt from the (8,128) rule)
    tm = max(8, min(m, max_block_bytes // (m * 4)))
    tm = (tm // 8) * 8
    while tm > 8 and m % tm != 0:
        tm -= 8
    if tm >= 8 and m % tm == 0:
        return tm
    return m                          # fallback: single full block


# ---------------------------------------------------------------------------
# Wrappers
# ---------------------------------------------------------------------------
def _reeig(x):
    """ReEig: rectify eigenvalues of a (B, h, n, n) batch of SPD matrices."""
    B, h, n, _ = x.shape
    bh = B * h
    # TODO(synk): symmetric eigendecomposition has no Pallas equivalent; done with XLA,
    # only the reconstruction runs in the Pallas kernel.
    w, u = jnp.linalg.eigh(x.reshape(bh, n, n).astype(jnp.float32))   # w: (bh, n), u: (bh, n, n)
    bb = _pick_batch_block(bh, n)

    rect = pl.pallas_call(
        _reeig_recon_kernel,
        out_shape=jax.ShapeDtypeStruct((bh, n, n), jnp.float32),
        grid_spec=pltpu.PrefetchScalarGridSpec(
            num_scalar_prefetch=0,
            grid=(bh // bb,),
            in_specs=[
                pl.BlockSpec((bb, n, n), lambda b: (b, 0, 0)),
                pl.BlockSpec((bb, 1, n), lambda b: (b, 0, 0)),
            ],
            out_specs=pl.BlockSpec((bb, n, n), lambda b: (b, 0, 0)),
        ),
        compiler_params=pltpu.CompilerParams(dimension_semantics=("parallel",)),
    )(u, w.reshape(bh, 1, n))
    return rect.reshape(B, h, n, n)


def _diag_stack(v):
    """torch.stack([torch.diag(row) for row in v]): (h, M) -> (h, M, M)."""
    h, m = v.shape
    tm = _pick_row_block(m)

    return pl.pallas_call(
        _diag_kernel,
        out_shape=jax.ShapeDtypeStruct((h, m, m), jnp.float32),
        grid_spec=pltpu.PrefetchScalarGridSpec(
            num_scalar_prefetch=0,
            grid=(h, m // tm),
            in_specs=[pl.BlockSpec((1, 1, m), lambda k, i: (k, 0, 0))],
            out_specs=pl.BlockSpec((1, tm, m), lambda k, i: (k, i, 0)),
        ),
        compiler_params=pltpu.CompilerParams(
            dimension_semantics=("parallel", "parallel")),
    )(v.reshape(h, 1, m).astype(jnp.float32))


def diagonalizing_layer(x, in_dim, out_dim, weight=None, bias=None):
    """Pallas implementation of DiagonalizingLayer.forward.

    x: (B, h, n, n) SPD matrices  ->  (h, M, M) diagonal matrices,
    M = B*n*n (times out_dim when in_dim != out_dim).
    """
    B, h, n, _ = x.shape
    rect = _reeig(x)                         # (B, h, n, n)
    v = rect.reshape(h, -1, 1)               # matches torch .view(x.shape[1], -1, 1)

    if in_dim != out_dim:
        # nn.Linear(in_dim, out_dim) acts on a (..., 1) tensor, so in_dim must be 1.
        if in_dim != 1:
            raise ValueError("in_dim must be 1 when in_dim != out_dim (Linear acts on a size-1 last dim)")
        if weight is None or bias is None:
            raise ValueError("weight/bias required when in_dim != out_dim")
        # TODO(synk): trivial (..,1)->(..,out_dim) affine kept in plain JAX; the heavy work
        # (eigen-reconstruction + diagonal embedding) runs in the Pallas kernels.
        v = v * weight[:, 0] + bias          # (h, M, 1) * (out_dim,) + (out_dim,) -> (h, M, out_dim)

    v = v.reshape(h, -1)                     # matches torch .view(x.shape[0], -1)
    return _diag_stack(v)


# ---------------------------------------------------------------------------
# Plain-JAX reference mirroring the PyTorch module
# ---------------------------------------------------------------------------
def _reference_forward(x, in_dim, out_dim, weight=None, bias=None):
    B, h, n, _ = x.shape
    w, u = jnp.linalg.eigh(x.reshape(B * h, n, n).astype(jnp.float32))
    w = jnp.maximum(w, _REEIG_EPS)
    rect = jnp.einsum("bij,bj,bkj->bik", u, w, u,
                      precision=jax.lax.Precision.HIGHEST).reshape(B, h, n, n)
    v = rect.reshape(h, -1, 1)
    if in_dim != out_dim:
        v = v * weight[:, 0] + bias
    v = v.reshape(h, -1)
    return jax.vmap(jnp.diag)(v)


if __name__ == "__main__":
    key = jax.random.PRNGKey(0)
    B, h, n = 2, 2, 8

    a = jax.random.normal(key, (B, h, n, n), dtype=jnp.float32)
    x = a @ jnp.swapaxes(a, -1, -2) + 1e-2 * jnp.eye(n, dtype=jnp.float32)   # SPD inputs

    # --- Test 1: in_dim == out_dim (Linear branch skipped) -----------------
    in_dim = out_dim = n * n
    out = jax.block_until_ready(diagonalizing_layer(x, in_dim, out_dim))
    ref = _reference_forward(x, in_dim, out_dim)
    M = B * n * n
    assert out.shape == (h, M, M), out.shape
    assert jnp.allclose(out, ref, atol=1e-3, rtol=1e-3), float(jnp.max(jnp.abs(out - ref)))

    # --- Test 2: in_dim != out_dim (Linear on the size-1 trailing dim) -----
    in_dim2, out_dim2 = 1, 2
    kw, kb = jax.random.split(jax.random.PRNGKey(1))
    weight = jax.random.normal(kw, (out_dim2, in_dim2), dtype=jnp.float32)
    bias = jax.random.normal(kb, (out_dim2,), dtype=jnp.float32)
    out2 = jax.block_until_ready(diagonalizing_layer(x, in_dim2, out_dim2, weight, bias))
    ref2 = _reference_forward(x, in_dim2, out_dim2, weight, bias)
    M2 = B * n * n * out_dim2
    assert out2.shape == (h, M2, M2), out2.shape
    assert jnp.allclose(out2, ref2, atol=1e-3, rtol=1e-3), float(jnp.max(jnp.abs(out2 - ref2)))

    print("KERNEL_OK")
</pallas_src>

<mosaic_0001>
module attributes {stable_mosaic.version = 11 : i64} {
  func.func @_reeig_recon_kernel(%arg0: i32, %arg1: memref<4x8x8xf32, #tpu.memory_space<vmem>>, %arg2: memref<4x1x8xf32, #tpu.memory_space<vmem>>, %arg3: memref<4x8x8xf32, #tpu.memory_space<vmem>>) attributes {dimension_semantics = [#tpu.dimension_semantics<parallel>], iteration_bounds = array<i64: 1>, scalar_prefetch = 0 : i64, scratch_operands = 0 : i64, tpu.core_type = #tpu.core_type<tc>, window_params = [{transform_indices = @transform_0, window_bounds = array<i64: 4, 8, 8>}, {transform_indices = @transform_1, window_bounds = array<i64: 4, 1, 8>}, {transform_indices = @transform_2, window_bounds = array<i64: 4, 8, 8>}]} {
    %c0 = arith.constant 0 : index
    %c0_0 = arith.constant 0 : index
    %c0_1 = arith.constant 0 : index
    %0 = vector.load %arg1[%c0, %c0_0, %c0_1] : memref<4x8x8xf32, #tpu.memory_space<vmem>>, vector<4x8x8xf32>
    %c0_2 = arith.constant 0 : index
    %c0_3 = arith.constant 0 : index
    %c0_4 = arith.constant 0 : index
    %1 = vector.load %arg2[%c0_2, %c0_3, %c0_4] : memref<4x1x8xf32, #tpu.memory_space<vmem>>, vector<4x1x8xf32>
    %cst = arith.constant 9.99999974E-5 : f32
    %2 = vector.broadcast %cst : f32 to vector<4x1x8xf32>
    %3 = arith.maximumf %1, %2 : vector<4x1x8xf32>
    %4 = vector.broadcast %3 : vector<4x1x8xf32> to vector<4x8x8xf32>
    %5 = arith.mulf %0, %4 : vector<4x8x8xf32>
    "tpu.trace_start"() <{level = 10 : i32, message = "bij,bkj->bik"}> : () -> ()
    %cst_5 = arith.constant dense<0.000000e+00> : vector<4x8x8xf32>
    %6 = tpu.matmul %5, %0, %cst_5 {dimension_numbers = #tpu.dot_dimension_numbers<[2], [2], [1], [1], [0, 0, 0, 1, 1, 1], [0], [0]>} : vector<4x8x8xf32>, vector<4x8x8xf32>, vector<4x8x8xf32> -> vector<4x8x8xf32>
    "tpu.trace_stop"() : () -> ()
    %c0_6 = arith.constant 0 : index
    %c0_7 = arith.constant 0 : index
    %c0_8 = arith.constant 0 : index
    %7 = vector.load %arg3[%c0_6, %c0_7, %c0_8] : memref<4x8x8xf32, #tpu.memory_space<vmem>>, vector<4x8x8xf32>
    tpu.vector_store %arg3[%c0_6, %c0_7, %c0_8], %6 {strides = array<i32>} : memref<4x8x8xf32, #tpu.memory_space<vmem>>, vector<4x8x8xf32>,
    return
  }
  func.func @transform_0(%arg0: i32) -> (i32, i32, i32) {
    %c0_i32 = arith.constant 0 : i32
    %c0_i32_0 = arith.constant 0 : i32
    %c0_i32_1 = arith.constant 0 : i32
    return %arg0, %c0_i32, %c0_i32_0 : i32, i32, i32
  }
  func.func @transform_1(%arg0: i32) -> (i32, i32, i32) {
    %c0_i32 = arith.constant 0 : i32
    %c0_i32_0 = arith.constant 0 : i32
    %c0_i32_1 = arith.constant 0 : i32
    return %arg0, %c0_i32, %c0_i32_0 : i32, i32, i32
  }
  func.func @transform_2(%arg0: i32) -> (i32, i32, i32) {
    %c0_i32 = arith.constant 0 : i32
    %c0_i32_0 = arith.constant 0 : i32
    %c0_i32_1 = arith.constant 0 : i32
    return %arg0, %c0_i32, %c0_i32_0 : i32, i32, i32
  }
}

</mosaic_0001>

<bundles_post_ra>
// kernel: tpu_custom_call.1
= control target key start
LH: loop header
LB: loop body
LE: loop exit
PB: predicated region body
PF: predicated region fallthrough
CT: control target
= control target key end

     0   :  { %7 = vsyncpa [#allocation3], 0  ;;  %s573_s0 = inlined_call_operand.hbm [shape: f32[4,8,8], index: 0, kind: input, shape index: {}]   ;;  %s574_s1 = inlined_call_operand.hbm [shape: f32[4,1,8], index: 1, kind: input, shape index: {}]   ;;  %s575_s2 = inlined_call_operand.hbm [shape: f32[4,8,8], index: 2, kind: output, shape index: {}]  }
   0x1   :  { %8 = vsyncpa [#allocation6], 0 }
   0x2   :  { %9 = vsyncpa [#allocation4], 0  ;;  %s518_s9 = smov [#allocation2]  }
   0x3   :  { %s15_s10 = sshll.u32 %s518_s9, 4  ;;  %s16_s10 = int_to_ptr.vmem [resolvable:$true] %s15_s10 }
   0x4   :  { %s460_s11 = scalar_lea.vmem %s16_s10, 512  ;;  %p465_p1 = scmp.lt.s32.totalorder %s16_s10, %s16_s10 }
   0x5   :  { %p461_p0 = scmp.ne.s32.totalorder %s16_s10, %s460_s11  ;;  %p466_p2 = scmp.lt.s32.totalorder %s460_s11, %s460_s11 }
   0x7   :  { %p467_p3 = por %p466_p2, %p465_p1 }
   0x9   :  { %p468_p4 = pnand %p467_p3, %p461_p0 }
   0xb   :  { %471 = shalt.err (!%p468_p4)
}
   0xc   :  { %s519_s12 = smov 128   ;;  %s520_s13 = smov 8  }
   0xd   :  { %21 = dma.hbm_to_vmem [thread:$0]  %s573_s0, 512, %s16_s10, [#allocation3], %s519_s12, %s519_s12, %s520_s13  }
   0xe   :  { %s521_s16 = smov [#allocation5]  }
   0xf   :  { %s27_s17 = sshll.u32 %s521_s16, 4  ;;  %s28_s17 = int_to_ptr.vmem [resolvable:$true] %s27_s17 }
  0x10   :  { %s480_s18 = scalar_lea.vmem %s28_s17, 64  ;;  %p485_p6 = scmp.lt.s32.totalorder %s28_s17, %s28_s17 }
  0x11   :  { %p481_p5 = scmp.ne.s32.totalorder %s28_s17, %s480_s18  ;;  %p486_p7 = scmp.lt.s32.totalorder %s480_s18, %s480_s18 }
  0x13   :  { %p487_p8 = por %p486_p7, %p485_p6 }
  0x15   :  { %p488_p9 = pnand %p487_p8, %p481_p5 }
  0x17   :  { %491 = shalt.err (!%p488_p9)
}
  0x18   :  { %s522_s19 = smov 16   ;;  %s523_s20 = smov 1  }
  0x19   :  { %33 = dma.hbm_to_vmem [thread:$0]  %s574_s1, 64, %s28_s17, [#allocation6], %s522_s19, %s522_s19, %s523_s20  }
  0x1a   :  { %512 = dma.done.wait [#allocation3], 512  }
  0x1b   :  { %513 = vsyncadd [#allocation3], 4294966784 }
  0x1c   :  { %514 = dma.done.wait [#allocation6], 64  }
  0x1d   :  { %515 = vsyncadd [#allocation6], 4294967232  ;;  %v56_v0 = vlaneseq  ;;  %v524_v1 = vmov 0.0   ;;  %vm525_vm0 = vmmov 0   ;;  %vm80_vm1 = vcmask 64512   ;;  %v40_v4 = vld [vmem:[#allocation2] sm:$0xff] }
  0x1e   :  { %423 = vmatprep.subr.mxu0 %v524_v1  ;;  %428 = vmatprep.subr.mxu1 %v524_v1  ;;  %v44_v5 = vld [vmem:[#allocation5] sm:$0x1]  ;;  %v41_v6 = vld [vmem:[#allocation2 + $0x8] sm:$0xff]  ;;  %v45_v8 = vld [vmem:[#allocation5 + $0x1] sm:$0x1]  ;;  %s526_s0 = smov [#allocation7]  }
  0x1f   :  { %v57_v2 = vshrl.u32 %v56_v0, 7  ;;  %425 = vmatprep.mubr.msk.f32.mxu0 %vm525_vm0, %v524_v1  ;;  %430 = vmatprep.mubr.msk.f32.mxu1 %vm525_vm0, %v524_v1  ;;  %v48_v7 = vmax.f32 %v44_v5, 0.0001  ;;  %v49_v9 = vmax.f32 %v45_v8, 0.0001  ;;  %v42_v16 = vld [vmem:[#allocation2 + $0x10] sm:$0xff] }
  0x20   :  { %424 = vmatpush3.xpose.msk.msra.mxu0 %vm80_vm1, %v40_v4  ;;  %429 = vmatpush3.xpose.msk.msra.mxu1 %vm80_vm1, %v41_v6  ;;  %v46_v10 = vld [vmem:[#allocation5 + $0x2] sm:$0x1]  ;;  %v47_v11 = vld [vmem:[#allocation5 + $0x3] sm:$0x1]  ;;  %v43_v19 = vld [vmem:[#allocation2 + $0x18] sm:$0xff]  ;;  %s394_s1 = sshll.u32 %s526_s0, 4  ;;  %s395_s1 = int_to_ptr.vmem [resolvable:$true] %s394_s1 }
  0x21   :  { %v58_v3 = vsub.s32 0, %v57_v2  ;;  %433 = vmatprep.subr.mxu0 %v524_v1  ;;  %438 = vmatprep.subr.mxu1 %v524_v1  ;;  %v50_v13 = vmax.f32 %v46_v10, 0.0001  ;;  %v51_v14 = vmax.f32 %v47_v11, 0.0001  ;;  %s492_s23 = scalar_lea.vmem %s395_s1, 512  ;;  %p497_p11 = scmp.lt.s32.totalorder %s395_s1, %s395_s1 }
  0x22   :  { %p493_p10 = scmp.ne.s32.totalorder %s395_s1, %s492_s23  ;;  %p498_p12 = scmp.lt.s32.totalorder %s492_s23, %s492_s23 }
  0x23   :  { %v59_v12 = vrot.slane %v48_v7, %v58_v3  ;;  %v63_v15 = vrot.slane %v49_v9, %v58_v3  ;;  %v67_v18 = vrot.slane %v50_v13, %v58_v3  ;;  %v71_v20 = vrot.slane %v51_v14, %v58_v3 }
  0x24   :  { %p499_p13 = por %p498_p12, %p497_p11 }
  0x25   :  { %v76_v17 = vmul.f32 %v59_v12, %v40_v4  ;;  %v77_v21 = vmul.f32 %v63_v15, %v41_v6  ;;  %v78_v22 = vmul.f32 %v67_v18, %v42_v16  ;;  %v79_v23 = vmul.f32 %v71_v20, %v43_v19 }
  0x26   :  { %p500_p0 = pnand %p499_p13, %p493_p10 }
  0x27   :  { %426 = vmatmul.mubr.msk.f32.vlgmr.msra.gmra.mxu0 %vm80_vm1, %v76_v17  ;;  %431 = vmatmul.mubr.msk.f32.vlgmr.msra.gmra.mxu1 %vm80_vm1, %v77_v21 }
  0x28   :  { %434 = vmatpush3.xpose.msk.msra.mxu0 %vm80_vm1, %v42_v16  ;;  %439 = vmatpush3.xpose.msk.msra.mxu1 %vm80_vm1, %v43_v19 }
  0x29   :  { %435 = vmatprep.mubr.msk.f32.mxu0 %vm525_vm0, %v524_v1  ;;  %440 = vmatprep.mubr.msk.f32.mxu1 %vm525_vm0, %v524_v1 }
  0x2b   :  { %436 = vmatmul.mubr.msk.f32.vlgmr.msra.gmra.mxu0 %vm80_vm1, %v78_v22  ;;  %441 = vmatmul.mubr.msk.f32.vlgmr.msra.gmra.mxu1 %vm80_vm1, %v79_v23 }
  0xe7   :  { %v153_v24 = vpop.f32.mrf.mxu0  ;;  %v229_v25 = vpop.f32.mrf.mxu1 }
  0xe8   :  { %385 = vst.msk [vmem:[#allocation7] sm:$0xff] %vm80_vm1, %v153_v24  ;;  %386 = vst.msk [vmem:[#allocation7 + $0x8] sm:$0xff] %vm80_vm1, %v229_v25 }
  0xe9   :  { %v427_v26 = vpop.f32.mrf.mxu0  ;;  %v432_v27 = vpop.f32.mrf.mxu1 }
  0xeb   :  { %v305_v28 = vpop.f32.mrf.mxu0  ;;  %v381_v29 = vpop.f32.mrf.mxu1 }
  0xec   :  { %387 = vst.msk [vmem:[#allocation7 + $0x10] sm:$0xff] %vm80_vm1, %v305_v28  ;;  %388 = vst.msk [vmem:[#allocation7 + $0x18] sm:$0xff] %vm80_vm1, %v381_v29 }
  0xed   :  { %v437_v30 = vpop.f32.mrf.mxu0  ;;  %v442_v31 = vpop.f32.mrf.mxu1 }
  0xee   :  { %503 = shalt.err (!%p500_p0)
}
  0xef   :  { %400 = dma.vmem_to_hbm [thread:$0]  %s395_s1, 512, %s575_s2, [#allocation4], %s519_s12, %s519_s12, %s520_s13  }
  0xf0   :  { %516 = dma.done.wait [#allocation4], 512  }
  0xf1   :  { %517 = vsyncadd [#allocation4], 4294966784 }
  0xf2   :  { %404 = vsyncpa [#allocation3], 1 }
  0xf3   :  { %405 = vsyncpa [#allocation6], 1 }
  0xf4   :  { %406 = vsyncpa [#allocation4], 1 }

</bundles_post_ra>
